<compile_context>
chip_gen: v5e
topology: v5e:2x2
jax: 0.10.0
libtpu: 0.0.40
codegen_flags: <defaults>
</compile_context>

<pallas_src>
import jax
import jax.numpy as jnp
from jax.experimental import pallas as pl
from jax.experimental.pallas import tpu as pltpu


def _affine_kernel(coef_ref, x0_ref, x1_ref, o_ref):
    # coef_ref (SMEM): [wc0, wc1, bc].  Pure VPU streaming: out = wc0*x0 + wc1*x1 + bc.
    w0 = coef_ref[0]
    w1 = coef_ref[1]
    b = coef_ref[2]
    o_ref[...] = x0_ref[...] * w0 + x1_ref[...] * w1 + b


def circles_v4_forward(x, params, tile_rows=2048):
    """x: [N, 2] float32. params: W1,b1,W2,b2,W3,b3 with W stored as [in, out]."""
    N = x.shape[0]

    # ---- Collapse the 3 affine layers into one (done once, on 10x10-sized arrays). ----
    wc = params["W1"] @ params["W2"] @ params["W3"]                          # [2, 1]
    bc = (params["b1"] @ params["W2"] + params["b2"]) @ params["W3"] + params["b3"]  # [1]
    coeffs = jnp.concatenate([wc[:, 0], bc]).astype(jnp.float32)             # (3,) -> SMEM

    # ---- Dense (rows, 128) slab layout for the batch axis. ----
    rows_min = -(-N // 128)                       # rows needed to hold N samples
    half_rows = ((rows_min + 15) // 16) * 8       # ~half the rows, multiple of 8
    tr = max(8, min(tile_rows, half_rows))        # tile rows: multiple of 8, grid >= 2 for large N
    rows = -(-rows_min // tr) * tr                # pad rows to a multiple of the tile
    n_pad = rows * 128
    grid = (rows // tr,)

    xf = x.astype(jnp.float32)
    xp = jnp.pad(xf, ((0, n_pad - N), (0, 0)))    # pad batch only (cheap, fused by XLA)
    x0 = xp[:, 0].reshape(rows, 128)              # contiguous feature planes, lane-dense
    x1 = xp[:, 1].reshape(rows, 128)

    out = pl.pallas_call(
        _affine_kernel,
        out_shape=jax.ShapeDtypeStruct((rows, 128), jnp.float32),
        grid=grid,
        in_specs=[
            pl.BlockSpec(memory_space=pltpu.MemorySpace.SMEM),   # 3 collapsed coefficients
            pl.BlockSpec((tr, 128), lambda i: (i, 0)),           # x feature-0 plane (streamed)
            pl.BlockSpec((tr, 128), lambda i: (i, 0)),           # x feature-1 plane (streamed)
        ],
        out_specs=pl.BlockSpec((tr, 128), lambda i: (i, 0)),     # lane-dense, unmasked stores
        compiler_params=pltpu.CompilerParams(
            dimension_semantics=("parallel",),                   # batch tiles across TCs (v7x)
            vmem_limit_bytes=32 * 1024 * 1024,
        ),
    )(coeffs, x0, x1)

    return out.reshape(-1)[:N].reshape(N, 1)      # free reshape, slice off padding


def init_params(key):
    """Deterministic init matching nn.Linear shapes (W stored as [in, out])."""
    ks = jax.random.split(key, 6)

    def uni(k, shape, fan_in):
        bound = 1.0 / jnp.sqrt(fan_in)
        return jax.random.uniform(k, shape, jnp.float32, -bound, bound)

    return {
        "W1": uni(ks[0], (2, 10), 2),   "b1": uni(ks[1], (10,), 2),
        "W2": uni(ks[2], (10, 10), 10), "b2": uni(ks[3], (10,), 10),
        "W3": uni(ks[4], (10, 1), 10),  "b3": uni(ks[5], (1,), 10),
    }


if __name__ == "__main__":
    key = jax.random.PRNGKey(0)
    k_x, k_p = jax.random.split(key)

    N = 8  # small batch matching the 2-feature "circles" classification input
    x = jax.random.normal(k_x, (N, 2), dtype=jnp.float32)
    params = init_params(k_p)

    out = circles_v4_forward(x, params)
    out = jax.block_until_ready(out)

    # Pure-JAX reference (same semantics as the PyTorch module: no activations).
    ref = x @ params["W1"] + params["b1"]
    ref = ref @ params["W2"] + params["b2"]
    ref = ref @ params["W3"] + params["b3"]

    assert out.shape == (N, 1)
    assert jnp.allclose(out, ref, atol=1e-4, rtol=1e-4)

    print("KERNEL_OK")
</pallas_src>

<mosaic_0001>
module attributes {stable_mosaic.version = 11 : i64} {
  func.func @_affine_kernel(%arg0: i32, %arg1: memref<3xf32, #tpu.memory_space<smem>>, %arg2: memref<8x128xf32, #tpu.memory_space<vmem>>, %arg3: memref<8x128xf32, #tpu.memory_space<vmem>>, %arg4: memref<8x128xf32, #tpu.memory_space<vmem>>) attributes {dimension_semantics = [#tpu.dimension_semantics<parallel>], iteration_bounds = array<i64: 1>, scalar_prefetch = 0 : i64, scratch_operands = 0 : i64, tpu.core_type = #tpu.core_type<tc>, window_params = [{transform_indices = @transform_0, window_bounds = array<i64: 3>}, {transform_indices = @transform_1, window_bounds = array<i64: 8, 128>}, {transform_indices = @transform_2, window_bounds = array<i64: 8, 128>}, {transform_indices = @transform_3, window_bounds = array<i64: 8, 128>}]} {
    %c0 = arith.constant 0 : index
    %0 = memref.load %arg1[%c0] : memref<3xf32, #tpu.memory_space<smem>>
    %c1 = arith.constant 1 : index
    %1 = memref.load %arg1[%c1] : memref<3xf32, #tpu.memory_space<smem>>
    %c2 = arith.constant 2 : index
    %2 = memref.load %arg1[%c2] : memref<3xf32, #tpu.memory_space<smem>>
    %c0_0 = arith.constant 0 : index
    %c0_1 = arith.constant 0 : index
    %3 = vector.load %arg2[%c0_0, %c0_1] : memref<8x128xf32, #tpu.memory_space<vmem>>, vector<8x128xf32>
    %4 = vector.broadcast %0 : f32 to vector<8x128xf32>
    %5 = arith.mulf %3, %4 : vector<8x128xf32>
    %c0_2 = arith.constant 0 : index
    %c0_3 = arith.constant 0 : index
    %6 = vector.load %arg3[%c0_2, %c0_3] : memref<8x128xf32, #tpu.memory_space<vmem>>, vector<8x128xf32>
    %7 = vector.broadcast %1 : f32 to vector<8x128xf32>
    %8 = arith.mulf %6, %7 : vector<8x128xf32>
    %9 = arith.addf %5, %8 : vector<8x128xf32>
    %10 = vector.broadcast %2 : f32 to vector<8x128xf32>
    %11 = arith.addf %9, %10 : vector<8x128xf32>
    %c0_4 = arith.constant 0 : index
    %c0_5 = arith.constant 0 : index
    %12 = vector.load %arg4[%c0_4, %c0_5] : memref<8x128xf32, #tpu.memory_space<vmem>>, vector<8x128xf32>
    tpu.vector_store %arg4[%c0_4, %c0_5], %11 {strides = array<i32>} : memref<8x128xf32, #tpu.memory_space<vmem>>, vector<8x128xf32>,
    return
  }
  func.func @transform_0(%arg0: i32) -> i32 {
    %c0_i32 = arith.constant 0 : i32
    %c0_i32_0 = arith.constant 0 : i32
    return %c0_i32 : i32
  }
  func.func @transform_1(%arg0: i32) -> (i32, i32) {
    %c0_i32 = arith.constant 0 : i32
    %c0_i32_0 = arith.constant 0 : i32
    return %arg0, %c0_i32 : i32, i32
  }
  func.func @transform_2(%arg0: i32) -> (i32, i32) {
    %c0_i32 = arith.constant 0 : i32
    %c0_i32_0 = arith.constant 0 : i32
    return %arg0, %c0_i32 : i32, i32
  }
  func.func @transform_3(%arg0: i32) -> (i32, i32) {
    %c0_i32 = arith.constant 0 : i32
    %c0_i32_0 = arith.constant 0 : i32
    return %arg0, %c0_i32 : i32, i32
  }
}

</mosaic_0001>

<bundles_post_ra>
// kernel: tpu_custom_call.1
= control target key start
LH: loop header
LB: loop body
LE: loop exit
PB: predicated region body
PF: predicated region fallthrough
CT: control target
= control target key end

     0   :  { %8 = vsyncpa [#allocation5], 0  ;;  %s222_s0 = inlined_call_operand.hbm [shape: f32[3], index: 0, kind: input, shape index: {}]   ;;  %s223_s1 = inlined_call_operand.hbm [shape: f32[8,128], index: 1, kind: input, shape index: {}]   ;;  %s224_s2 = inlined_call_operand.hbm [shape: f32[8,128], index: 2, kind: input, shape index: {}]   ;;  %s225_s3 = inlined_call_operand.hbm [shape: f32[8,128], index: 3, kind: output, shape index: {}]  }
   0x1   :  { %9 = vsyncpa [#allocation3], 0 }
   0x2   :  { %10 = vsyncpa [#allocation8], 0 }
   0x3   :  { %11 = vsyncpa [#allocation4], 0  ;;  %s17_s14 = sshll.u32 %s222_s0, 4  ;;  %s26_s17 = sshll.u32 %s223_s1, 4  ;;  %s18_s14 = int_to_ptr.hbm [resolvable:$true] %s17_s14  ;;  %s27_s17 = int_to_ptr.hbm [resolvable:$true] %s26_s17 }
   0x4   :  { %s186_s18 = smov [#allocation2]   ;;  %s187_s19 = smov [#allocation6]  }
   0x5   :  { %20 = dma.hbm_to_smem %s18_s14, 16, %s186_s18, [#allocation5]  }
   0x6   :  { %s28_s20 = sshll.u32 %s187_s19, 4  ;;  %s37_s23 = sshll.u32 %s224_s2, 4  ;;  %s29_s20 = int_to_ptr.vmem [resolvable:$true] %s28_s20  ;;  %s38_s23 = int_to_ptr.hbm [resolvable:$true] %s37_s23 }
   0x7   :  { %31 = dma.hbm_to_vmem [thread:$0]  %s27_s17, 128, %s29_s20, [#allocation3]  }
   0x8   :  { %s188_s24 = smov [#allocation7]  }
   0x9   :  { %s39_s25 = sshll.u32 %s188_s24, 4  ;;  %s40_s25 = int_to_ptr.vmem [resolvable:$true] %s39_s25 }
   0xa   :  { %42 = dma.hbm_to_vmem [thread:$0]  %s38_s23, 128, %s40_s25, [#allocation8]  }
   0xb   :  { %178 = dma.done.wait [#allocation5], 16  }
   0xc   :  { %179 = vsyncadd [#allocation5], 4294967280 }
   0xd   :  { %180 = dma.done.wait [#allocation3], 128  }
   0xe   :  { %181 = vsyncadd [#allocation3], 4294967168 }
   0xf   :  { %182 = dma.done.wait [#allocation8], 128  }
  0x10   :  { %183 = vsyncadd [#allocation8], 4294967168 }
  0x11   :  { %55 = sfence }
  0x12   :  { %s56_s0 = sld [smem:[#allocation2]]  ;;  %v59_v0 = vld [vmem:[#allocation6] sm:$0xff]  ;;  %v62_v1 = vld [vmem:[#allocation7] sm:$0xff]  ;;  %s189_s2 = smov [#allocation9]  }
  0x13   :  { %s88_s1 = sld [smem:[#allocation2 + $0x1]]  ;;  %s74_s27 = sshll.u32 %s189_s2, 4  ;;  %s75_s27 = int_to_ptr.vmem [resolvable:$true] %s74_s27 }
  0x14   :  { %s89_s26 = sld [smem:[#allocation2 + $0x2]]  ;;  %s76_s30 = sshll.u32 %s225_s3, 4  ;;  %s77_s30 = int_to_ptr.hbm [resolvable:$true] %s76_s30 }
  0x18   :  { %v60_v2 = vstv %s56_s0 }
  0x19   :  { %v61_v3 = vmul.f32 %v60_v2, %v59_v0  ;;  %v63_v4 = vstv %s88_s1 }
  0x1a   :  { %v64_v5 = vmul.f32 %v63_v4, %v62_v1  ;;  %v66_v6 = vstv %s89_s26 }
  0x1c   :  { %v65_v7 = vadd.f32 %v64_v5, %v61_v3 }
  0x1e   :  { %v67_v8 = vadd.f32 %v66_v6, %v65_v7 }
  0x20   :  { %68 = vst [vmem:[#allocation9] sm:$0xff] %v67_v8 }
  0x21   :  { %79 = dma.vmem_to_hbm [thread:$0]  %s75_s27, 128, %s77_s30, [#allocation4]  }
  0x22   :  { %184 = dma.done.wait [#allocation4], 128  }
  0x23   :  { %185 = vsyncadd [#allocation4], 4294967168 }
  0x24   :  { %84 = vsyncpa [#allocation3], 1 }
  0x25   :  { %85 = vsyncpa [#allocation8], 1 }
  0x26   :  { %86 = vsyncpa [#allocation4], 1 }
  0x27   :  { %87 = vsyncpa [#allocation5], 1 }

</bundles_post_ra>
